<compile_context>
chip_gen: v7x
topology: tpu7x:2x2x1
jax: 0.10.0
libtpu: 0.0.40
codegen_flags: <defaults>
</compile_context>

<pallas_src>
from functools import partial

import jax
import jax.numpy as jnp
from jax.experimental import pallas as pl
from jax.experimental.pallas import tpu as pltpu

TILE_B = 128  # states processed per grid step (one full MXU-sized LHS tile)


def _round_up(x, m):
    return ((x + m - 1) // m) * m


def agent_kernel(states_ref, w1t_ref, b1_ref, w2t_ref, b2_ref, out_ref):
    # states_ref : (Bp, 1)      int32  ALL state indices (VMEM-resident, const index_map)
    # w1t_ref    : (OBSp, Hp)   f32    l1 weight, transposed, zero padded
    # b1_ref     : (1,  Hp)     f32    l1 bias, zero padded
    # w2t_ref    : (Hp, Ap)     f32    l2 weight, transposed, zero padded
    # b2_ref     : (1,  Ap)     f32    l2 bias, zero padded
    # out_ref    : (TILE_B, Ap) f32    this tile's output rows
    start = pl.multiple_of(pl.program_id(0) * TILE_B, TILE_B)
    states = states_ref[pl.ds(start, TILE_B), :]                  # (TILE_B, 1)

    obsp = w1t_ref.shape[0]
    # one_hot(state) @ W1.T is just a row gather of W1.T; build the one-hot
    # selector in-kernel (no host-side one_hot / scatter, no float input DMA)
    # and let the MXU do the gather in a single pass.
    cols = jax.lax.broadcasted_iota(jnp.int32, (TILE_B, obsp), 1)
    onehot = (cols == states).astype(jnp.float32)                 # (TILE_B, OBSp)

    h = jnp.dot(onehot, w1t_ref[...], preferred_element_type=jnp.float32) + b1_ref[...]
    # Padding invariant (asserted at buffer build time): padded hidden columns
    # have w1t == 0 and b1 == 0, so they hit sigmoid(0) = 0.5 and then multiply
    # zero-padded rows of W2.T -> contribute nothing.
    h = jax.nn.sigmoid(h)
    out_ref[...] = (
        jnp.dot(h, w2t_ref[...], preferred_element_type=jnp.float32) + b2_ref[...]
    )


@partial(jax.jit, static_argnums=(5,))
def _agent_forward(states, w1t_p, b1_p, w2t_p, b2_p, action_space_size):
    """states: (B,) int32.  Padding, pallas_call and un-padding all under one jit.

    B is a static shape under jit, so the pad/slice fuse with the kernel launch
    (one compile per distinct batch size)."""
    states = states.astype(jnp.int32).reshape(-1)
    b = states.shape[0]
    bp = _round_up(max(b, 1), TILE_B)
    num_tiles = bp // TILE_B
    # Padded rows get state 0; they select a valid row but are sliced off below.
    states_p = jnp.zeros((bp, 1), jnp.int32).at[:b, 0].set(states)

    obsp, hp = w1t_p.shape
    ap = w2t_p.shape[1]

    out_p = pl.pallas_call(
        agent_kernel,
        out_shape=jax.ShapeDtypeStruct((bp, ap), jnp.float32),
        grid=(num_tiles,),
        in_specs=[
            # constant block index => states + weights/biases stay VMEM-resident
            # across the whole grid; nothing is re-streamed per tile.
            pl.BlockSpec((bp, 1), lambda i: (0, 0)),
            pl.BlockSpec((obsp, hp), lambda i: (0, 0)),
            pl.BlockSpec((1, hp), lambda i: (0, 0)),
            pl.BlockSpec((hp, ap), lambda i: (0, 0)),
            pl.BlockSpec((1, ap), lambda i: (0, 0)),
        ],
        out_specs=pl.BlockSpec((TILE_B, ap), lambda i: (i, 0)),
        compiler_params=pltpu.CompilerParams(
            # batch tiles are independent: shard across both TCs on v7x
            dimension_semantics=("parallel",)
        ),
    )(states_p, w1t_p, b1_p, w2t_p, b2_p)
    return out_p[:b, :action_space_size]


class AgentPallas:
    """JAX/Pallas port of the PyTorch `Agent` module."""

    def __init__(self, observation_space_size, action_space_size, key):
        self.observation_space_size = observation_space_size
        self.hidden_size = observation_space_size
        self.action_space_size = action_space_size

        k1, k2 = jax.random.split(key)
        # uniform_linear_layer: weight ~ U(0,1), bias = -0.02 (torch (out, in) layout)
        w1 = jax.random.uniform(
            k1, (self.hidden_size, observation_space_size), dtype=jnp.float32
        )
        b1 = jnp.full((self.hidden_size,), -0.02, dtype=jnp.float32)
        w2 = jax.random.uniform(
            k2, (action_space_size, self.hidden_size), dtype=jnp.float32
        )
        b2 = jnp.full((action_space_size,), -0.02, dtype=jnp.float32)

        # lane-aligned padded sizes; zero padding is mathematically inert here
        # (see padding-invariant note in the kernel).
        self._OBSp = _round_up(observation_space_size, 128)
        self._Hp = _round_up(self.hidden_size, 128)
        self._Ap = _round_up(action_space_size, 128)

        self.update_weights(w1, b1, w2, b2)

    def update_weights(self, w1, b1, w2, b2):
        """Set (unpadded) weights and rebuild the padded kernel buffers.

        Always go through this method after a training step so forward() never
        sees stale padded copies."""
        self.w1, self.b1, self.w2, self.b2 = w1, b1, w2, b2
        obs, hid, act = self.observation_space_size, self.hidden_size, self.action_space_size

        self._w1t_p = (
            jnp.zeros((self._OBSp, self._Hp), jnp.float32).at[:obs, :hid].set(w1.T)
        )
        self._b1_p = jnp.zeros((1, self._Hp), jnp.float32).at[0, :hid].set(b1)
        self._w2t_p = (
            jnp.zeros((self._Hp, self._Ap), jnp.float32).at[:hid, :act].set(w2.T)
        )
        self._b2_p = jnp.zeros((1, self._Ap), jnp.float32).at[0, :act].set(b2)

        # The zero padding is load-bearing: padded hidden units evaluate to
        # sigmoid(0) = 0.5 and must multiply exactly-zero W2.T rows / b1 cols.
        assert bool(jnp.all(self._w1t_p[:, hid:] == 0.0))
        assert bool(jnp.all(self._b1_p[:, hid:] == 0.0))
        assert bool(jnp.all(self._w2t_p[hid:, :] == 0.0))
        assert bool(jnp.all(self._b2_p[:, act:] == 0.0))

    def forward_batch(self, states):
        """Vectorized evaluation: (B,) int states -> (B, action_space) values."""
        states = jnp.asarray(states, jnp.int32).reshape(-1)
        return _agent_forward(
            states, self._w1t_p, self._b1_p, self._w2t_p, self._b2_p,
            self.action_space_size,
        )

    def forward(self, state):
        """Matches the PyTorch forward: one int state -> (action_space,) vector.
        Note: like jax.nn.one_hot, an out-of-range state selects no row and the
        result degenerates to sigmoid(b1) @ W2.T + b2 (PyTorch would raise)."""
        return self.forward_batch(jnp.asarray([state], jnp.int32))[0]


def _reference_forward_batch(agent, states):
    """Pure-JAX reference of the PyTorch forward, for a sanity check."""
    obs = jax.nn.one_hot(
        jnp.asarray(states, jnp.int32),
        agent.observation_space_size,
        dtype=jnp.float32,
    ).reshape(-1, agent.observation_space_size)
    h = jax.nn.sigmoid(obs @ agent.w1.T + agent.b1)
    return h @ agent.w2.T + agent.b2


if __name__ == "__main__":
    key = jax.random.PRNGKey(0)
    observation_space_size = 16  # e.g. FrozenLake 4x4 grid
    action_space_size = 4

    agent = AgentPallas(observation_space_size, action_space_size, key)

    # Single-state forward (original module semantics: .view(-1) of one row).
    state = 5
    out = jax.block_until_ready(agent.forward(state))
    ref = _reference_forward_batch(agent, [state])[0]
    assert out.shape == (action_space_size,)
    assert jnp.allclose(out, ref, atol=1e-5, rtol=1e-5), (out, ref)

    # Batched forward: amortizes launch + weight DMA across many env states
    # (B deliberately not a multiple of the tile to exercise padding/slicing).
    states = jnp.arange(18, dtype=jnp.int32) % observation_space_size
    out_b = jax.block_until_ready(agent.forward_batch(states))
    ref_b = _reference_forward_batch(agent, states)
    assert out_b.shape == (18, action_space_size)
    assert jnp.allclose(out_b, ref_b, atol=1e-5, rtol=1e-5), (out_b, ref_b)

    # Larger batch spanning multiple grid tiles (exercises the in-kernel
    # pl.ds slicing of the VMEM-resident states array and megacore sharding).
    states_big = (jax.random.randint(key, (300,), 0, observation_space_size)
                  .astype(jnp.int32))
    out_big = jax.block_until_ready(agent.forward_batch(states_big))
    ref_big = _reference_forward_batch(agent, states_big)
    assert out_big.shape == (300, action_space_size)
    assert jnp.allclose(out_big, ref_big, atol=1e-5, rtol=1e-5)

    # Weight update path: padded buffers must track the new weights.
    agent.update_weights(agent.w1 * 0.5, agent.b1 + 0.1, agent.w2 * 2.0, agent.b2)
    out_u = jax.block_until_ready(agent.forward_batch(states))
    ref_u = _reference_forward_batch(agent, states)
    assert jnp.allclose(out_u, ref_u, atol=1e-5, rtol=1e-5)

    print("KERNEL_OK")
</pallas_src>

<mosaic_0001>
module attributes {stable_mosaic.version = 11 : i64} {
  func.func @agent_kernel(%arg0: i32, %arg1: memref<128x1xi32, #tpu.memory_space<vmem>>, %arg2: memref<128x128xf32, #tpu.memory_space<vmem>>, %arg3: memref<1x128xf32, #tpu.memory_space<vmem>>, %arg4: memref<128x128xf32, #tpu.memory_space<vmem>>, %arg5: memref<1x128xf32, #tpu.memory_space<vmem>>, %arg6: memref<128x128xf32, #tpu.memory_space<vmem>>) attributes {dimension_semantics = [#tpu.dimension_semantics<parallel>], iteration_bounds = array<i64: 1>, scalar_prefetch = 0 : i64, scratch_operands = 0 : i64, tpu.core_type = #tpu.core_type<tc>, window_params = [{pipeline_mode = #tpu.pipeline_mode<synchronous>, transform_indices = @transform_0, window_bounds = array<i64: 128, 1>}, {pipeline_mode = #tpu.pipeline_mode<synchronous>, transform_indices = @transform_1, window_bounds = array<i64: 128, 128>}, {pipeline_mode = #tpu.pipeline_mode<synchronous>, transform_indices = @transform_2, window_bounds = array<i64: 1, 128>}, {pipeline_mode = #tpu.pipeline_mode<synchronous>, transform_indices = @transform_3, window_bounds = array<i64: 128, 128>}, {pipeline_mode = #tpu.pipeline_mode<synchronous>, transform_indices = @transform_4, window_bounds = array<i64: 1, 128>}, {transform_indices = @transform_5, window_bounds = array<i64: 128, 128>}]} {
    %c128_i32 = arith.constant 128 : i32
    %0 = arith.muli %arg0, %c128_i32 : i32
    %1 = tpu.assume_multiple %0, 128 : i32
    %2 = arith.index_cast %1 : i32 to index
    %c0 = arith.constant 0 : index
    %3 = vector.load %arg1[%2, %c0] : memref<128x1xi32, #tpu.memory_space<vmem>>, vector<128x1xi32>
    %4 = tpu.iota {dimensions = array<i32: 1>} : vector<128x128xi32>
    %5 = vector.broadcast %3 : vector<128x1xi32> to vector<128x128xi32>
    %6 = arith.cmpi eq, %4, %5 : vector<128x128xi32>
    %7 = arith.extui %6 : vector<128x128xi1> to vector<128x128xi32>
    %8 = arith.sitofp %7 : vector<128x128xi32> to vector<128x128xf32>
    %c0_0 = arith.constant 0 : index
    %c0_1 = arith.constant 0 : index
    %9 = vector.load %arg2[%c0_0, %c0_1] : memref<128x128xf32, #tpu.memory_space<vmem>>, vector<128x128xf32>
    %cst = arith.constant dense<0.000000e+00> : vector<128x128xf32>
    %10 = tpu.matmul %8, %9, %cst {dimension_numbers = #tpu.dot_dimension_numbers<[1], [0], [0], [1], [0, 0, 1, 1], [], []>} : vector<128x128xf32>, vector<128x128xf32>, vector<128x128xf32> -> vector<128x128xf32>
    %c0_2 = arith.constant 0 : index
    %c0_3 = arith.constant 0 : index
    %11 = vector.load %arg3[%c0_2, %c0_3] : memref<1x128xf32, #tpu.memory_space<vmem>>, vector<1x128xf32>
    %12 = vector.broadcast %11 : vector<1x128xf32> to vector<128x128xf32>
    %13 = arith.addf %10, %12 : vector<128x128xf32>
    %14 = arith.negf %13 : vector<128x128xf32>
    %15 = math.exp %14 : vector<128x128xf32>
    %cst_4 = arith.constant 1.000000e+00 : f32
    %16 = vector.broadcast %cst_4 : f32 to vector<128x128xf32>
    %17 = arith.addf %16, %15 : vector<128x128xf32>
    %18 = arith.divf %16, %17 : vector<128x128xf32>
    %c0_5 = arith.constant 0 : index
    %c0_6 = arith.constant 0 : index
    %19 = vector.load %arg4[%c0_5, %c0_6] : memref<128x128xf32, #tpu.memory_space<vmem>>, vector<128x128xf32>
    %cst_7 = arith.constant dense<0.000000e+00> : vector<128x128xf32>
    %20 = tpu.matmul %18, %19, %cst_7 {dimension_numbers = #tpu.dot_dimension_numbers<[1], [0], [0], [1], [0, 0, 1, 1], [], []>} : vector<128x128xf32>, vector<128x128xf32>, vector<128x128xf32> -> vector<128x128xf32>
    %c0_8 = arith.constant 0 : index
    %c0_9 = arith.constant 0 : index
    %21 = vector.load %arg5[%c0_8, %c0_9] : memref<1x128xf32, #tpu.memory_space<vmem>>, vector<1x128xf32>
    %22 = vector.broadcast %21 : vector<1x128xf32> to vector<128x128xf32>
    %23 = arith.addf %20, %22 : vector<128x128xf32>
    %c0_10 = arith.constant 0 : index
    %c0_11 = arith.constant 0 : index
    %24 = vector.load %arg6[%c0_10, %c0_11] : memref<128x128xf32, #tpu.memory_space<vmem>>, vector<128x128xf32>
    tpu.vector_store %arg6[%c0_10, %c0_11], %23 {strides = array<i32>} : memref<128x128xf32, #tpu.memory_space<vmem>>, vector<128x128xf32>,
    return
  }
  func.func @transform_0(%arg0: i32) -> (i32, i32) {
    %c0_i32 = arith.constant 0 : i32
    %c0_i32_0 = arith.constant 0 : i32
    %c0_i32_1 = arith.constant 0 : i32
    return %c0_i32, %c0_i32_0 : i32, i32
  }
  func.func @transform_1(%arg0: i32) -> (i32, i32) {
    %c0_i32 = arith.constant 0 : i32
    %c0_i32_0 = arith.constant 0 : i32
    %c0_i32_1 = arith.constant 0 : i32
    return %c0_i32, %c0_i32_0 : i32, i32
  }
  func.func @transform_2(%arg0: i32) -> (i32, i32) {
    %c0_i32 = arith.constant 0 : i32
    %c0_i32_0 = arith.constant 0 : i32
    %c0_i32_1 = arith.constant 0 : i32
    return %c0_i32, %c0_i32_0 : i32, i32
  }
  func.func @transform_3(%arg0: i32) -> (i32, i32) {
    %c0_i32 = arith.constant 0 : i32
    %c0_i32_0 = arith.constant 0 : i32
    %c0_i32_1 = arith.constant 0 : i32
    return %c0_i32, %c0_i32_0 : i32, i32
  }
  func.func @transform_4(%arg0: i32) -> (i32, i32) {
    %c0_i32 = arith.constant 0 : i32
    %c0_i32_0 = arith.constant 0 : i32
    %c0_i32_1 = arith.constant 0 : i32
    return %c0_i32, %c0_i32_0 : i32, i32
  }
  func.func @transform_5(%arg0: i32) -> (i32, i32) {
    %c0_i32 = arith.constant 0 : i32
    %c0_i32_0 = arith.constant 0 : i32
    return %arg0, %c0_i32 : i32, i32
  }
}

</mosaic_0001>

<bundles_post_ra>
// kernel: _agent_forward.1
= control target key start
LH: loop header
LB: loop body
LE: loop exit
PB: predicated region body
PF: predicated region fallthrough
CT: control target
= control target key end

     0   :  { %10 = vsyncpa [#allocation3], 0  ;;  %s988_s18 = smov [#allocation2]   ;;  %s1203_s0 = inlined_call_operand.vmem [shape: s32[128,1], index: 0, kind: input, shape index: {}]   ;;  %s1204_s1 = inlined_call_operand.vmem [shape: f32[128,128], index: 1, kind: input, shape index: {}]   ;;  %s1205_s2 = inlined_call_operand.vmem [shape: f32[1,128], index: 2, kind: input, shape index: {}]   ;;  %s1206_s3 = inlined_call_operand.hbm [shape: f32[128,128], index: 3, kind: input, shape index: {}]   ;;  %s1207_s4 = inlined_call_operand.vmem [shape: f32[1,128], index: 4, kind: input, shape index: {}]   ;;  %s1208_s5 = inlined_call_operand.vmem [shape: f32[128,128], index: 5, kind: output, shape index: {}]  }
   0x1   :  { %s22_s19 = sshll.u32 %s988_s18, 4  ;;  %s964_s22 = scalar_lea.hbm %s1206_s3, 2048  ;;  %s23_s19 = int_to_ptr.vmem [resolvable:$true] %s22_s19 }
   0x2   :  { %p965_p0 = scmp.ne.s32.totalorder %s1206_s3, %s964_s22  ;;  %p968_p1 = scmp.lt.u32.totalorder %s964_s22, %s1206_s3 }
   0x4   :  { %p970_p2 = pnand %p968_p1, %p965_p0 }
   0x6   :  { %973 = shalt.err (!%p970_p2)
}
   0x7   :  { %s974_s27 = scalar_lea.vmem %s23_s19, 2048  ;;  %p979_p4 = scmp.lt.s32.totalorder %s23_s19, %s23_s19 }
   0x8   :  { %p975_p3 = scmp.ne.s32.totalorder %s23_s19, %s974_s27  ;;  %p980_p5 = scmp.lt.s32.totalorder %s974_s27, %s974_s27 }
   0xa   :  { %p981_p6 = por %p980_p5, %p979_p4 }
   0xc   :  { %p982_p7 = pnand %p981_p6, %p975_p3 }
   0xe   :  { %985 = shalt.err (!%p982_p7)
}
   0xf   :  { %s989_s28 = smov 128   ;;  %s990_s29 = smov 8  }
  0x10   :  { %28 = dma.hbm_to_vmem [thread:$0]  %s1206_s3, 2048, %s23_s19, [#allocation3], %s989_s28, %s989_s28, %s990_s29  }
  0x11   :  { %986 = dma.done.wait [#allocation3], 2048  }
  0x12   :  { %987 = vsyncadd [#allocation3], 4294965248  ;;  %v991_v0 = vmov 0   ;;  %v38_v1 = vld [vmem:[%s1203_s0 + $0x10] sm:$0xff]  ;;  %v36_v2 = vld [vmem:[%s1203_s0] sm:$0xff]  ;;  %v52_v44 = vlaneseq  ;;  %v992_v48 = vmov 1.0  }
  0x13   :  { %899 = vset.pattern.permute.xlu1 %v991_v0  ;;  %898 = vset.pattern.permute.xlu0 %v991_v0  ;;  %v39_v3 = vld [vmem:[%s1203_s0 + $0x18] sm:$0xff]  ;;  %v37_v4 = vld [vmem:[%s1203_s0 + $0x8] sm:$0xff]  ;;  %v150_v6 = vld [vmem:[%s1204_s1] sm:$0xff] }
  0x14   :  { %61 = vperm.xlu1 %899, %v38_v1   ;;  %55 = vperm.xlu0 %898, %v36_v2   ;;  %v41_v5 = vld [vmem:[%s1203_s0 + $0x28] sm:$0xff]  ;;  %v40_v8 = vld [vmem:[%s1203_s0 + $0x20] sm:$0xff]  ;;  %v152_v10 = vld [vmem:[%s1204_s1 + $0x10] sm:$0xff]  ;;  %v53_v45 = vand.u32 127, %v52_v44 }
  0x15   :  { %v151_v7 = vld [vmem:[%s1204_s1 + $0x8] sm:$0xff]  ;;  %v153_v11 = vld [vmem:[%s1204_s1 + $0x18] sm:$0xff]  ;;  %v154_v13 = vld [vmem:[%s1204_s1 + $0x20] sm:$0xff] }
  0x16   :  { %v829_v9 = vpack.c.bf16 %v151_v7, %v150_v6  ;;  %v833_v12 = vpack.c.bf16 %v153_v11, %v152_v10  ;;  %v155_v14 = vld [vmem:[%s1204_s1 + $0x28] sm:$0xff]  ;;  %v43_v15 = vld [vmem:[%s1203_s0 + $0x38] sm:$0xff]  ;;  %v42_v16 = vld [vmem:[%s1203_s0 + $0x30] sm:$0xff] }
  0x17   :  { %v837_v17 = vpack.c.bf16 %v155_v14, %v154_v13  ;;  %v156_v18 = vld [vmem:[%s1204_s1 + $0x30] sm:$0xff]  ;;  %v157_v19 = vld [vmem:[%s1204_s1 + $0x38] sm:$0xff]  ;;  %v45_v20 = vld [vmem:[%s1203_s0 + $0x48] sm:$0xff] }
  0x18   :  { %64 = vperm.xlu1 %899, %v39_v3   ;;  %58 = vperm.xlu0 %898, %v37_v4   ;;  %v44_v21 = vld [vmem:[%s1203_s0 + $0x40] sm:$0xff]  ;;  %v841_v22 = vpack.c.bf16 %v157_v19, %v156_v18  ;;  %v159_v24 = vld [vmem:[%s1204_s1 + $0x48] sm:$0xff]  ;;  %v47_v25 = vld [vmem:[%s1203_s0 + $0x58] sm:$0xff] }
  0x19   :  { %830 = vmatprep.subr.bf16.mxu0 %v829_v9  ;;  %v158_v23 = vld [vmem:[%s1204_s1 + $0x40] sm:$0xff]  ;;  %v46_v26 = vld [vmem:[%s1203_s0 + $0x50] sm:$0xff]  ;;  %v161_v29 = vld [vmem:[%s1204_s1 + $0x58] sm:$0xff] }
  0x1a   :  { %832 = vmatpush3.bf16.msra.mxu0 %v829_v9  ;;  %v845_v27 = vpack.c.bf16 %v159_v24, %v158_v23  ;;  %v160_v28 = vld [vmem:[%s1204_s1 + $0x50] sm:$0xff]  ;;  %v49_v30 = vld [vmem:[%s1203_s0 + $0x68] sm:$0xff]  ;;  %v48_v31 = vld [vmem:[%s1203_s0 + $0x60] sm:$0xff] }
  0x1b   :  { %834 = vmatprep.subr.bf16.mxu0 %v833_v12  ;;  %v849_v32 = vpack.c.bf16 %v161_v29, %v160_v28  ;;  %v162_v33 = vld [vmem:[%s1204_s1 + $0x60] sm:$0xff]  ;;  %v163_v34 = vld [vmem:[%s1204_s1 + $0x68] sm:$0xff]  ;;  %v51_v35 = vld [vmem:[%s1203_s0 + $0x78] sm:$0xff] }
  0x1c   :  { %70 = vperm.xlu1 %899, %v41_v5   ;;  %67 = vperm.xlu0 %898, %v40_v8   ;;  %v50_v36 = vld [vmem:[%s1203_s0 + $0x70] sm:$0xff]  ;;  %v853_v37 = vpack.c.bf16 %v163_v34, %v162_v33  ;;  %v165_v39 = vld [vmem:[%s1204_s1 + $0x78] sm:$0xff]  ;;  %v414_v41 = vld [vmem:[#allocation2] sm:$0xff] }
  0x1d   :  { %v164_v38 = vld [vmem:[%s1204_s1 + $0x70] sm:$0xff]  ;;  %v415_v42 = vld [vmem:[#allocation2 + $0x8] sm:$0xff]  ;;  %v417_v0 = vld [vmem:[#allocation2 + $0x18] sm:$0xff] }
  0x1e   :  { %836 = vmatpush3.bf16.msra.mxu0 %v833_v12  ;;  %v857_v40 = vpack.c.bf16 %v165_v39, %v164_v38  ;;  %v861_v43 = vpack.c.bf16 %v415_v42, %v414_v41  ;;  %v416_v63 = vld [vmem:[#allocation2 + $0x10] sm:$0xff]  ;;  %v418_v2 = vld [vmem:[#allocation2 + $0x20] sm:$0xff]  ;;  %v419_v3 = vld [vmem:[#allocation2 + $0x28] sm:$0xff] }
  0x1f   :  { %838 = vmatprep.subr.bf16.mxu0 %v837_v17  ;;  %v865_v1 = vpack.c.bf16 %v417_v0, %v416_v63  ;;  %v869_v4 = vpack.c.bf16 %v419_v3, %v418_v2  ;;  %v420_v5 = vld [vmem:[#allocation2 + $0x30] sm:$0xff]  ;;  %v421_v6 = vld [vmem:[#allocation2 + $0x38] sm:$0xff]  ;;  %v422_v8 = vld [vmem:[#allocation2 + $0x40] sm:$0xff] }
  0x20   :  { %76 = vperm.xlu1 %899, %v43_v15   ;;  %73 = vperm.xlu0 %898, %v42_v16   ;;  %v873_v7 = vpack.c.bf16 %v421_v6, %v420_v5  ;;  %v423_v9 = vld [vmem:[#allocation2 + $0x48] sm:$0xff]  ;;  %v424_v11 = vld [vmem:[#allocation2 + $0x50] sm:$0xff]  ;;  %v425_v12 = vld [vmem:[#allocation2 + $0x58] sm:$0xff] }
  0x21   :  { %862 = vmatprep.subr.bf16.mxu1 %v861_v43  ;;  %v877_v10 = vpack.c.bf16 %v423_v9, %v422_v8  ;;  %v881_v13 = vpack.c.bf16 %v425_v12, %v424_v11  ;;  %v426_v14 = vld [vmem:[#allocation2 + $0x60] sm:$0xff]  ;;  %v427_v15 = vld [vmem:[#allocation2 + $0x68] sm:$0xff]  ;;  %v429_v18 = vld [vmem:[#allocation2 + $0x78] sm:$0xff] }
  0x22   :  { %840 = vmatpush3.bf16.msra.mxu0 %v837_v17  ;;  %864 = vmatpush3.bf16.msra.mxu1 %v861_v43  ;;  %v885_v16 = vpack.c.bf16 %v427_v15, %v426_v14  ;;  %v428_v17 = vld [vmem:[#allocation2 + $0x70] sm:$0xff] }
  0x23   :  { %842 = vmatprep.subr.bf16.mxu0 %v841_v22  ;;  %866 = vmatprep.subr.bf16.mxu1 %v865_v1  ;;  %v889_v19 = vpack.c.bf16 %v429_v18, %v428_v17 }
  0x24   :  { %82 = vperm.xlu1 %899, %v45_v20   ;;  %79 = vperm.xlu0 %898, %v44_v21   ;;  %v1134_v20 = vld [vmem:[%s1205_s2] ss:$0 sm:$0xff] }
  0x26   :  { %844 = vmatpush3.bf16.msra.mxu0 %v841_v22  ;;  %868 = vmatpush3.bf16.msra.mxu1 %v865_v1 }
  0x27   :  { %846 = vmatprep.subr.bf16.mxu0 %v845_v27  ;;  %870 = vmatprep.subr.bf16.mxu1 %v869_v4 }
  0x28   :  { %88 = vperm.xlu1 %899, %v47_v25   ;;  %85 = vperm.xlu0 %898, %v46_v26  }
  0x2a   :  { %848 = vmatpush3.bf16.msra.mxu0 %v845_v27  ;;  %872 = vmatpush3.bf16.msra.mxu1 %v869_v4 }
  0x2b   :  { %850 = vmatprep.subr.bf16.mxu0 %v849_v32  ;;  %874 = vmatprep.subr.bf16.mxu1 %v873_v7 }
  0x2c   :  { %94 = vperm.xlu1 %899, %v49_v30   ;;  %91 = vperm.xlu0 %898, %v48_v31  }
  0x2e   :  { %852 = vmatpush3.bf16.msra.mxu0 %v849_v32  ;;  %876 = vmatpush3.bf16.msra.mxu1 %v873_v7 }
  0x2f   :  { %854 = vmatprep.subr.bf16.mxu0 %v853_v37  ;;  %878 = vmatprep.subr.bf16.mxu1 %v877_v10 }
  0x30   :  { %100 = vperm.xlu1 %899, %v51_v35   ;;  %97 = vperm.xlu0 %898, %v50_v36  }
  0x32   :  { %856 = vmatpush3.bf16.msra.mxu0 %v853_v37  ;;  %880 = vmatpush3.bf16.msra.mxu1 %v877_v10 }
  0x33   :  { %858 = vmatprep.subr.bf16.mxu0 %v857_v40  ;;  %882 = vmatprep.subr.bf16.mxu1 %v881_v13 }
  0x36   :  { %860 = vmatpush3.bf16.msra.mxu0 %v857_v40  ;;  %884 = vmatpush3.bf16.msra.mxu1 %v881_v13 }
  0x37   :  { %886 = vmatprep.subr.bf16.mxu1 %v885_v16 }
  0x3a   :  { %888 = vmatpush3.bf16.msra.mxu1 %v885_v16 }
  0x3b   :  { %890 = vmatprep.subr.bf16.mxu1 %v889_v19 }
  0x3e   :  { %892 = vmatpush3.bf16.msra.mxu1 %v889_v19 }
  0x93   :  { %v62_v46 = vpop.permute.xlu1 %61  ;;  %v56_v47 = vpop.permute.xlu0 %55 }
  0x94   :  { %vm102_vm0 = vcmp.eq.s32.totalorder %v53_v45, %v56_v47  ;;  %vm104_vm1 = vcmp.eq.s32.totalorder %v53_v45, %v62_v46 }
  0x95   :  { %749 = vmatprep.mubr.msk.f32.mxu0 %vm102_vm0, %v992_v48 }
  0x97   :  { %v65_v49 = vpop.permute.xlu1 %64  ;;  %v59_v50 = vpop.permute.xlu0 %58 }
  0x98   :  { %vm103_vm2 = vcmp.eq.s32.totalorder %v53_v45, %v59_v50  ;;  %vm105_vm3 = vcmp.eq.s32.totalorder %v53_v45, %v65_v49 }
  0x99   :  { %750 = vmatmul.mubr.msk.f32.vlgmr.msra.gmra.mrb[0].mxu0 %vm103_vm2, %v992_v48 }
  0x9a   :  { %752 = vmatprep.mubr.msk.f32.mxu0 %vm104_vm1, %v992_v48 }
  0x9b   :  { %v71_v51 = vpop.permute.xlu1 %70  ;;  %v68_v52 = vpop.permute.xlu0 %67 }
  0x9c   :  { %vm106_vm4 = vcmp.eq.s32.totalorder %v53_v45, %v68_v52  ;;  %vm107_vm5 = vcmp.eq.s32.totalorder %v53_v45, %v71_v51 }
  0x9d   :  { %753 = vmatmul.mubr.msk.f32.gmra.mrb[2].mxu0 %vm105_vm3, %v992_v48 }
  0x9e   :  { %755 = vmatprep.mubr.msk.f32.mxu0 %vm106_vm4, %v992_v48 }
  0x9f   :  { %v77_v53 = vpop.permute.xlu1 %76  ;;  %v74_v54 = vpop.permute.xlu0 %73 }
  0xa0   :  { %vm108_vm6 = vcmp.eq.s32.totalorder %v53_v45, %v74_v54  ;;  %vm109_vm7 = vcmp.eq.s32.totalorder %v53_v45, %v77_v53 }
  0xa1   :  { %756 = vmatmul.mubr.msk.f32.gmra.mrb[4].mxu0 %vm107_vm5, %v992_v48 }
  0xa2   :  { %758 = vmatprep.mubr.msk.f32.mxu0 %vm108_vm6, %v992_v48 }
  0xa3   :  { %v83_v55 = vpop.permute.xlu1 %82  ;;  %v80_v56 = vpop.permute.xlu0 %79 }
  0xa4   :  { %vm110_vm8 = vcmp.eq.s32.totalorder %v53_v45, %v80_v56  ;;  %vm111_vm9 = vcmp.eq.s32.totalorder %v53_v45, %v83_v55 }
  0xa5   :  { %759 = vmatmul.mubr.msk.f32.gmra.mrb[6].mxu0 %vm109_vm7, %v992_v48 }
  0xa6   :  { %761 = vmatprep.mubr.msk.f32.mxu0 %vm110_vm8, %v992_v48 }
  0xa7   :  { %v89_v57 = vpop.permute.xlu1 %88  ;;  %v86_v58 = vpop.permute.xlu0 %85 }
  0xa8   :  { %vm112_vm10 = vcmp.eq.s32.totalorder %v53_v45, %v86_v58  ;;  %vm113_vm11 = vcmp.eq.s32.totalorder %v53_v45, %v89_v57 }
  0xa9   :  { %762 = vmatmul.mubr.msk.f32.gmra.mrb[8].mxu0 %vm111_vm9, %v992_v48 }
  0xaa   :  { %764 = vmatprep.mubr.msk.f32.mxu0 %vm112_vm10, %v992_v48 }
  0xab   :  { %v95_v59 = vpop.permute.xlu1 %94  ;;  %v92_v60 = vpop.permute.xlu0 %91 }
  0xac   :  { %vm114_vm12 = vcmp.eq.s32.totalorder %v53_v45, %v92_v60  ;;  %vm115_vm13 = vcmp.eq.s32.totalorder %v53_v45, %v95_v59 }
  0xad   :  { %765 = vmatmul.mubr.msk.f32.gmra.mrb[10].mxu0 %vm113_vm11, %v992_v48 }
  0xae   :  { %767 = vmatprep.mubr.msk.f32.mxu0 %vm114_vm12, %v992_v48 }
  0xaf   :  { %v98_v61 = vpop.permute.xlu0 %97  ;;  %v101_v62 = vpop.permute.xlu1 %100 }
  0xb0   :  { %vm116_vm14 = vcmp.eq.s32.totalorder %v53_v45, %v98_v61  ;;  %vm117_vm15 = vcmp.eq.s32.totalorder %v53_v45, %v101_v62 }
  0xb1   :  { %768 = vmatmul.mubr.msk.f32.gmra.mrb[12].mxu0 %vm115_vm13, %v992_v48 }
  0xb2   :  { %770 = vmatprep.mubr.msk.f32.mxu0 %vm116_vm14, %v992_v48 }
  0xb5   :  { %771 = vmatmul.mubr.msk.f32.gmra.mrb[14].mxu0 %vm117_vm15, %v992_v48 }
 0x16c   :  { %v751_v21 = vpop.f32.mrb[0].mxu0 }
 0x16d   :  { %v245_v22 = vadd.f32 %v751_v21, %v1134_v20  ;;  %v239_v23 = vpop.f32.mrb[1].mxu0 }
 0x16e   :  { %v240_v24 = vadd.f32 %v1134_v20, %v239_v23 }
 0x16f   :  { %v637_v25 = vmul.f32 -1.442695, %v245_v22 }
 0x170   :  { %v636_v26 = vmul.f32 -1.442695, %v240_v24  ;;  %v754_v27 = vpop.f32.mrb[2].mxu0 }
 0x171   :  { %900 = vpow2.f32 %v637_v25  ;;  %v255_v28 = vadd.f32 %v754_v27, %v1134_v20  ;;  %v249_v29 = vpop.f32.mrb[3].mxu0 }
 0x172   :  { %902 = vpow2.f32 %v636_v26  ;;  %v250_v30 = vadd.f32 %v1134_v20, %v249_v29 }
 0x173   :  { %v639_v31 = vmul.f32 -1.442695, %v255_v28 }
 0x174   :  { %v638_v32 = vmul.f32 -1.442695, %v250_v30  ;;  %v757_v33 = vpop.f32.mrb[4].mxu0 }
 0x175   :  { %904 = vpow2.f32 %v639_v31  ;;  %v265_v34 = vadd.f32 %v757_v33, %v1134_v20  ;;  %v259_v35 = vpop.f32.mrb[5].mxu0 }
 0x176   :  { %906 = vpow2.f32 %v638_v32  ;;  %v260_v36 = vadd.f32 %v1134_v20, %v259_v35 }
 0x177   :  { %v641_v37 = vmul.f32 -1.442695, %v265_v34 }
 0x178   :  { %v640_v38 = vmul.f32 -1.442695, %v260_v36  ;;  %v760_v39 = vpop.f32.mrb[6].mxu0 }
 0x179   :  { %908 = vpow2.f32 %v641_v37  ;;  %v275_v40 = vadd.f32 %v760_v39, %v1134_v20  ;;  %v269_v41 = vpop.f32.mrb[7].mxu0 }
 0x17a   :  { %910 = vpow2.f32 %v640_v38  ;;  %v270_v42 = vadd.f32 %v1134_v20, %v269_v41 }
 0x17b   :  { %v901_v43 = vpop.eup %900  ;;  %v643_v44 = vmul.f32 -1.442695, %v275_v40 }
 0x17c   :  { %v903_v45 = vpop.eup %902  ;;  %v367_v46 = vadd.f32 1.0, %v901_v43  ;;  %v642_v47 = vmul.f32 -1.442695, %v270_v42  ;;  %v763_v48 = vpop.f32.mrb[8].mxu0 }
 0x17d   :  { %912 = vpow2.f32 %v643_v44  ;;  %v285_v49 = vadd.f32 %v763_v48, %v1134_v20  ;;  %v279_v50 = vpop.f32.mrb[9].mxu0  ;;  %v366_v51 = vadd.f32 1.0, %v903_v45 }
 0x17e   :  { %914 = vrcp.f32 %v367_v46  ;;  %v280_v52 = vadd.f32 %v1134_v20, %v279_v50 }
 0x17f   :  { %v905_v53 = vpop.eup %904  ;;  %916 = vpow2.f32 %v642_v47  ;;  %v645_v54 = vmul.f32 -1.442695, %v285_v49 }
 0x180   :  { %v907_v55 = vpop.eup %906  ;;  %v369_v56 = vadd.f32 1.0, %v905_v53  ;;  %v644_v57 = vmul.f32 -1.442695, %v280_v52  ;;  %v766_v58 = vpop.f32.mrb[10].mxu0  ;;  %918 = vrcp.f32 %v366_v51  ;;  %v652_v53 = vld [vmem:[%s1207_s4] ss:$0 sm:$0xff] }
 0x181   :  { %v368_v59 = vadd.f32 1.0, %v907_v55  ;;  %920 = vpow2.f32 %v645_v54  ;;  %v295_v60 = vadd.f32 %v766_v58, %v1134_v20  ;;  %v289_v61 = vpop.f32.mrb[11].mxu0 }
 0x182   :  { %922 = vrcp.f32 %v369_v56  ;;  %v290_v62 = vadd.f32 %v1134_v20, %v289_v61 }
 0x183   :  { %v909_v63 = vpop.eup %908  ;;  %924 = vrcp.f32 %v368_v59  ;;  %v647_v0 = vmul.f32 -1.442695, %v295_v60 }
 0x184   :  { %v911_v1 = vpop.eup %910  ;;  %v371_v2 = vadd.f32 1.0, %v909_v63  ;;  %926 = vpow2.f32 %v644_v57  ;;  %v646_v3 = vmul.f32 -1.442695, %v290_v62  ;;  %v769_v4 = vpop.f32.mrb[12].mxu0 }
 0x185   :  { %v370_v5 = vadd.f32 1.0, %v911_v1  ;;  %928 = vpow2.f32 %v647_v0  ;;  %v305_v6 = vadd.f32 %v769_v4, %v1134_v20  ;;  %v299_v7 = vpop.f32.mrb[13].mxu0 }
 0x186   :  { %930 = vrcp.f32 %v371_v2  ;;  %v300_v8 = vadd.f32 %v1134_v20, %v299_v7 }
 0x187   :  { %v913_v9 = vpop.eup %912  ;;  %932 = vrcp.f32 %v370_v5  ;;  %v649_v10 = vmul.f32 -1.442695, %v305_v6 }
 0x188   :  { %v915_v11 = vpop.eup %914  ;;  %v373_v12 = vadd.f32 1.0, %v913_v9  ;;  %934 = vpow2.f32 %v646_v3  ;;  %v648_v13 = vmul.f32 -1.442695, %v300_v8  ;;  %v772_v14 = vpop.f32.mrb[14].mxu0 }
 0x189   :  { %v917_v15 = vpop.eup %916  ;;  %936 = vpow2.f32 %v649_v10  ;;  %v315_v16 = vadd.f32 %v772_v14, %v1134_v20  ;;  %v309_v17 = vpop.f32.mrb[15].mxu0 }
 0x18a   :  { %v919_v18 = vpop.eup %918  ;;  %938 = vrcp.f32 %v373_v12  ;;  %v372_v19 = vadd.f32 1.0, %v917_v15  ;;  %v310_v21 = vadd.f32 %v1134_v20, %v309_v17 }
 0x18b   :  { %v921_v22 = vpop.eup %920  ;;  %940 = vpow2.f32 %v648_v13  ;;  %v651_v23 = vmul.f32 -1.442695, %v315_v16  ;;  %805 = vmatprep.mubr.f32.mxu1 %v919_v18 }
 0x18c   :  { %v923_v24 = vpop.eup %922  ;;  %942 = vrcp.f32 %v372_v19  ;;  %v650_v25 = vmul.f32 -1.442695, %v310_v21  ;;  %806 = vmatmul.mubr.f32.vlgmr.msra.gmra.mrb[0].mxu1 %v915_v11  ;;  %v375_v28 = vadd.f32 1.0, %v921_v22 }
 0x18d   :  { %v925_v26 = vpop.eup %924  ;;  %944 = vpow2.f32 %v651_v23 }
 0x18e   :  { %v927_v27 = vpop.eup %926  ;;  %808 = vmatprep.mubr.f32.mxu1 %v925_v26  ;;  %946 = vpow2.f32 %v650_v25 }
 0x18f   :  { %v929_v29 = vpop.eup %928  ;;  %v374_v30 = vadd.f32 1.0, %v927_v27 }
 0x190   :  { %v931_v31 = vpop.eup %930  ;;  %809 = vmatmul.mubr.f32.gmra.mrb[2].mxu1 %v923_v24  ;;  %v377_v33 = vadd.f32 1.0, %v929_v29 }
 0x191   :  { %v933_v32 = vpop.eup %932  ;;  %948 = vrcp.f32 %v374_v30 }
 0x192   :  { %v935_v20 = vpop.eup %934  ;;  %950 = vrcp.f32 %v375_v28  ;;  %811 = vmatprep.mubr.f32.mxu1 %v933_v32 }
 0x193   :  { %v937_v34 = vpop.eup %936  ;;  %v376_v35 = vadd.f32 1.0, %v935_v20 }
 0x194   :  { %v939_v36 = vpop.eup %938  ;;  %812 = vmatmul.mubr.f32.gmra.mrb[4].mxu1 %v931_v31  ;;  %v379_v39 = vadd.f32 1.0, %v937_v34 }
 0x195   :  { %v941_v37 = vpop.eup %940  ;;  %952 = vrcp.f32 %v376_v35 }
 0x196   :  { %v943_v38 = vpop.eup %942  ;;  %954 = vrcp.f32 %v377_v33  ;;  %v378_v40 = vadd.f32 1.0, %v941_v37 }
 0x197   :  { %v945_v41 = vpop.eup %944  ;;  %814 = vmatprep.mubr.f32.mxu1 %v943_v38 }
 0x198   :  { %956 = vrcp.f32 %v378_v40  ;;  %815 = vmatmul.mubr.f32.gmra.mrb[6].mxu1 %v939_v36  ;;  %v947_v42 = vpop.eup %946  ;;  %v381_v43 = vadd.f32 1.0, %v945_v41 }
 0x199   :  { %958 = vrcp.f32 %v379_v39  ;;  %v380_v44 = vadd.f32 1.0, %v947_v42 }
 0x19b   :  { %v949_v45 = vpop.eup %948  ;;  %960 = vrcp.f32 %v380_v44 }
 0x19c   :  { %v951_v46 = vpop.eup %950  ;;  %817 = vmatprep.mubr.f32.mxu1 %v949_v45  ;;  %962 = vrcp.f32 %v381_v43 }
 0x19d   :  { %818 = vmatmul.mubr.f32.gmra.mrb[8].mxu1 %v951_v46 }
 0x19f   :  { %v953_v47 = vpop.eup %952 }
 0x1a0   :  { %v955_v48 = vpop.eup %954  ;;  %820 = vmatprep.mubr.f32.mxu1 %v953_v47 }
 0x1a1   :  { %821 = vmatmul.mubr.f32.gmra.mrb[10].mxu1 %v955_v48 }
 0x1a2   :  { %v957_v49 = vpop.eup %956 }
 0x1a3   :  { %823 = vmatprep.mubr.f32.mxu1 %v957_v49  ;;  %v959_v50 = vpop.eup %958 }
 0x1a5   :  { %824 = vmatmul.mubr.f32.gmra.mrb[12].mxu1 %v959_v50  ;;  %v961_v51 = vpop.eup %960 }
 0x1a6   :  { %826 = vmatprep.mubr.f32.mxu1 %v961_v51  ;;  %v963_v52 = vpop.eup %962 }
 0x1a9   :  { %827 = vmatmul.mubr.f32.gmra.mrb[14].mxu1 %v963_v52 }
 0x25f   :  { %v807_v54 = vpop.f32.mrb[0].mxu1 }
 0x260   :  { %v509_v55 = vadd.f32 %v807_v54, %v652_v53  ;;  %v503_v56 = vpop.f32.mrb[1].mxu1 }
 0x261   :  { %v504_v57 = vadd.f32 %v652_v53, %v503_v56 }
 0x262   :  { %583 = vst [vmem:[%s1208_s5 + $0x8] sm:$0xff] %v509_v55 }
 0x263   :  { %582 = vst [vmem:[%s1208_s5] sm:$0xff] %v504_v57  ;;  %v810_v58 = vpop.f32.mrb[2].mxu1 }
 0x264   :  { %v519_v59 = vadd.f32 %v810_v58, %v652_v53  ;;  %v513_v60 = vpop.f32.mrb[3].mxu1 }
 0x265   :  { %v514_v61 = vadd.f32 %v652_v53, %v513_v60 }
 0x266   :  { %585 = vst [vmem:[%s1208_s5 + $0x18] sm:$0xff] %v519_v59 }
 0x267   :  { %584 = vst [vmem:[%s1208_s5 + $0x10] sm:$0xff] %v514_v61  ;;  %v813_v62 = vpop.f32.mrb[4].mxu1 }
 0x268   :  { %v529_v63 = vadd.f32 %v813_v62, %v652_v53  ;;  %v523_v0 = vpop.f32.mrb[5].mxu1 }
 0x269   :  { %v524_v1 = vadd.f32 %v652_v53, %v523_v0 }
 0x26a   :  { %587 = vst [vmem:[%s1208_s5 + $0x28] sm:$0xff] %v529_v63 }
 0x26b   :  { %586 = vst [vmem:[%s1208_s5 + $0x20] sm:$0xff] %v524_v1  ;;  %v816_v2 = vpop.f32.mrb[6].mxu1 }
 0x26c   :  { %v539_v3 = vadd.f32 %v816_v2, %v652_v53  ;;  %v533_v4 = vpop.f32.mrb[7].mxu1 }
 0x26d   :  { %v534_v5 = vadd.f32 %v652_v53, %v533_v4 }
 0x26e   :  { %589 = vst [vmem:[%s1208_s5 + $0x38] sm:$0xff] %v539_v3 }
 0x26f   :  { %588 = vst [vmem:[%s1208_s5 + $0x30] sm:$0xff] %v534_v5 }
 0x270   :  { %v819_v6 = vpop.f32.mrb[8].mxu1 }
 0x271   :  { %v549_v7 = vadd.f32 %v819_v6, %v652_v53  ;;  %v543_v8 = vpop.f32.mrb[9].mxu1 }
 0x272   :  { %v544_v9 = vadd.f32 %v652_v53, %v543_v8 }
 0x273   :  { %591 = vst [vmem:[%s1208_s5 + $0x48] sm:$0xff] %v549_v7 }
 0x274   :  { %590 = vst [vmem:[%s1208_s5 + $0x40] sm:$0xff] %v544_v9  ;;  %v822_v10 = vpop.f32.mrb[10].mxu1 }
 0x275   :  { %v559_v11 = vadd.f32 %v822_v10, %v652_v53  ;;  %v553_v12 = vpop.f32.mrb[11].mxu1 }
 0x276   :  { %v554_v13 = vadd.f32 %v652_v53, %v553_v12 }
 0x277   :  { %593 = vst [vmem:[%s1208_s5 + $0x58] sm:$0xff] %v559_v11 }
 0x278   :  { %592 = vst [vmem:[%s1208_s5 + $0x50] sm:$0xff] %v554_v13  ;;  %v825_v14 = vpop.f32.mrb[12].mxu1 }
 0x279   :  { %v569_v15 = vadd.f32 %v825_v14, %v652_v53  ;;  %v563_v16 = vpop.f32.mrb[13].mxu1 }
 0x27a   :  { %v564_v17 = vadd.f32 %v652_v53, %v563_v16 }
 0x27b   :  { %595 = vst [vmem:[%s1208_s5 + $0x68] sm:$0xff] %v569_v15 }
 0x27c   :  { %594 = vst [vmem:[%s1208_s5 + $0x60] sm:$0xff] %v564_v17  ;;  %v828_v18 = vpop.f32.mrb[14].mxu1 }
 0x27d   :  { %v579_v19 = vadd.f32 %v828_v18, %v652_v53  ;;  %v573_v21 = vpop.f32.mrb[15].mxu1 }
 0x27e   :  { %v574_v22 = vadd.f32 %v652_v53, %v573_v21 }
 0x27f   :  { %597 = vst [vmem:[%s1208_s5 + $0x78] sm:$0xff] %v579_v19 }
 0x280   :  { %596 = vst [vmem:[%s1208_s5 + $0x70] sm:$0xff] %v574_v22 }
 0x281   :  { %602 = vsyncpa [#allocation3], 1 }

</bundles_post_ra>
